<compile_context>
chip_gen: v7x
topology: tpu7x:2x2x1
jax: 0.10.0
libtpu: 0.0.40
codegen_flags: <defaults>
</compile_context>

<pallas_src>
import functools

import jax
import jax.numpy as jnp
from jax.experimental import pallas as pl
from jax.experimental.pallas import tpu as pltpu


_MAX_TILE = 4096  # lanes per grid step (multiple of 128); full extent if D is smaller


def _diff_loss_kernel(a_ref, b_ref, out_ref, ga_acc, gb_acc, *,
                      d1, d2, tk_a, tk_b, ka, kb, inv_count):
    k = pl.program_id(0)
    nk = pl.num_programs(0)

    @pl.when(k == 0)
    def _init():
        ga_acc[...] = jnp.zeros_like(ga_acc)
        gb_acc[...] = jnp.zeros_like(gb_acc)

    def _accum(x_ref, acc_ref, d, tk):
        x = x_ref[...]                                  # (32, tk), native dtype
        if d % tk:                                      # last tile partial: zero OOB lanes
            col = jax.lax.broadcasted_iota(jnp.int32, x.shape, 1) + k * tk
            x = jnp.where(col < d, x, jnp.zeros_like(x))
        # Raw Gram X X^T, contracting the (long) feature axis on the MXU.
        acc_ref[...] += jax.lax.dot_general(
            x, x,
            dimension_numbers=(((1,), (1,)), ((), ())),
            preferred_element_type=jnp.float32)

    if ka == kb:
        _accum(a_ref, ga_acc, d1, tk_a)
        _accum(b_ref, gb_acc, d2, tk_b)
    else:
        pl.when(k < ka)(lambda: _accum(a_ref, ga_acc, d1, tk_a))
        pl.when(k < kb)(lambda: _accum(b_ref, gb_acc, d2, tk_b))

    @pl.when(k == nk - 1)
    def _finalize():
        ga = ga_acc[...]                                # (32, 32) f32
        gb = gb_acc[...]
        ii = jax.lax.broadcasted_iota(jnp.int32, (32, 32), 0)
        jj = jax.lax.broadcasted_iota(jnp.int32, (32, 32), 1)
        eye = ii == jj
        da = jnp.where(eye, ga, 0.0)
        db = jnp.where(eye, gb, 0.0)
        # s_i = 1 / ((|a_i| + 1e-6) * (|b_i| + 1e-6)), as column and row vectors.
        s_col = (1.0 / (jnp.sqrt(jnp.sum(da, axis=1, keepdims=True)) + 1e-6) *
                 1.0 / (jnp.sqrt(jnp.sum(db, axis=1, keepdims=True)) + 1e-6))   # (32, 1)
        s_row = (1.0 / (jnp.sqrt(jnp.sum(da, axis=0, keepdims=True)) + 1e-6) *
                 1.0 / (jnp.sqrt(jnp.sum(db, axis=0, keepdims=True)) + 1e-6))   # (1, 32)
        # sum_{i,j} GA_ij GB_ij s_i s_j  ==  ||A_n^T B_n||_F^2
        total = jnp.sum(ga * gb * s_col * s_row)
        out_ref[...] = (total * inv_count).reshape(1, 1)


def _tile(d):
    if d <= _MAX_TILE:
        return d, 1                      # full-extent block: no pad / mask needed
    return _MAX_TILE, pl.cdiv(d, _MAX_TILE)


def _in_spec(tk, kcount, nk):
    if kcount == nk:
        index_map = lambda k: (0, k)
    else:
        last = kcount - 1
        index_map = lambda k: (0, jnp.minimum(k, last))   # clamp: no refetch past last block
    return pl.BlockSpec((32, tk), index_map)


@jax.jit
def diff_loss(input1, input2):
    # Original module hard-codes view(32, -1); keep the same row-major flatten.
    a = input1.reshape(32, -1)           # native dtype, no upcast / no pad
    b = input2.reshape(32, -1)
    d1 = a.shape[1]
    d2 = b.shape[1]
    tk_a, ka = _tile(d1)
    tk_b, kb = _tile(d2)
    nk = max(ka, kb)

    kernel = functools.partial(
        _diff_loss_kernel, d1=d1, d2=d2, tk_a=tk_a, tk_b=tk_b,
        ka=ka, kb=kb, inv_count=1.0 / float(d1 * d2))

    # TODO(synk): for very large D on v7x, split the feature-axis grid across the
    # 2 TensorCores (core_map) with per-core partial Grams and a final combine.
    out = pl.pallas_call(
        kernel,
        out_shape=jax.ShapeDtypeStruct((1, 1), jnp.float32),
        grid_spec=pltpu.PrefetchScalarGridSpec(
            num_scalar_prefetch=0,
            grid=(nk,),
            in_specs=[_in_spec(tk_a, ka, nk), _in_spec(tk_b, kb, nk)],
            out_specs=pl.BlockSpec((1, 1), lambda k: (0, 0)),
            scratch_shapes=[pltpu.VMEM((32, 32), jnp.float32),
                            pltpu.VMEM((32, 32), jnp.float32)]),
        compiler_params=pltpu.CompilerParams(
            dimension_semantics=("arbitrary",)),
    )(a, b)
    return out[0, 0]


def _diff_loss_ref(input1, input2):
    # Pure-JAX reference mirroring the PyTorch forward.
    a = input1.reshape(32, -1).astype(jnp.float32)
    b = input2.reshape(32, -1).astype(jnp.float32)
    a_n = a / (jnp.linalg.norm(a, axis=1, keepdims=True) + 1e-6)
    b_n = b / (jnp.linalg.norm(b, axis=1, keepdims=True) + 1e-6)
    m = a_n.T @ b_n
    return jnp.mean(m ** 2)


if __name__ == "__main__":
    # DiffLoss hard-codes view(32, -1), so the leading batch must be 32.
    key = jax.random.PRNGKey(0)
    k1, k2, k3 = jax.random.split(key, 3)
    x1 = jax.random.normal(k1, (32, 4, 8, 8), dtype=jnp.float32)   # -> (32, 256)
    x2 = jax.random.normal(k2, (32, 4, 8, 8), dtype=jnp.float32)   # -> (32, 256)

    out = jax.block_until_ready(diff_loss(x1, x2))
    ref = jax.block_until_ready(_diff_loss_ref(x1, x2))
    assert jnp.allclose(out, ref, rtol=1e-5, atol=1e-6), (out, ref)

    # Mismatched feature widths also pass through view(32, -1) in the original.
    x3 = jax.random.normal(k3, (32, 2, 8, 8), dtype=jnp.float32)   # -> (32, 128)
    out2 = jax.block_until_ready(diff_loss(x1, x3))
    ref2 = jax.block_until_ready(_diff_loss_ref(x1, x3))
    assert jnp.allclose(out2, ref2, rtol=1e-5, atol=1e-6), (out2, ref2)

    print("KERNEL_OK")
</pallas_src>

<mosaic_0001>
module attributes {stable_mosaic.version = 11 : i64} {
  func.func @_diff_loss_kernel(%arg0: i32, %arg1: memref<32x256xf32, #tpu.memory_space<vmem>>, %arg2: memref<32x256xf32, #tpu.memory_space<vmem>>, %arg3: memref<1x1xf32, #tpu.memory_space<vmem>>, %arg4: memref<32x32xf32, #tpu.memory_space<vmem>>, %arg5: memref<32x32xf32, #tpu.memory_space<vmem>>) attributes {dimension_semantics = [#tpu.dimension_semantics<arbitrary>], iteration_bounds = array<i64: 1>, scalar_prefetch = 0 : i64, scratch_operands = 2 : i64, tpu.core_type = #tpu.core_type<tc>, window_params = [{transform_indices = @transform_0, window_bounds = array<i64: 32, 256>}, {transform_indices = @transform_1, window_bounds = array<i64: 32, 256>}, {pipeline_mode = #tpu.pipeline_mode<synchronous>, transform_indices = @transform_2, window_bounds = array<i64: 1, 1>}]} {
    %c0_i32 = arith.constant 0 : i32
    %0 = arith.cmpi eq, %arg0, %c0_i32 : i32
    %1 = arith.extui %0 : i1 to i32
    %c0_i32_0 = arith.constant 0 : i32
    %2 = arith.cmpi ne, %1, %c0_i32_0 : i32
    scf.if %2 {
      %cst_15 = arith.constant 0.000000e+00 : f32
      %16 = vector.broadcast %cst_15 : f32 to vector<32x32xf32>
      %c0_16 = arith.constant 0 : index
      %c0_17 = arith.constant 0 : index
      %17 = vector.load %arg4[%c0_16, %c0_17] : memref<32x32xf32, #tpu.memory_space<vmem>>, vector<32x32xf32>
      tpu.vector_store %arg4[%c0_16, %c0_17], %16 {strides = array<i32>} : memref<32x32xf32, #tpu.memory_space<vmem>>, vector<32x32xf32>,
      %cst_18 = arith.constant 0.000000e+00 : f32
      %18 = vector.broadcast %cst_18 : f32 to vector<32x32xf32>
      %c0_19 = arith.constant 0 : index
      %c0_20 = arith.constant 0 : index
      %19 = vector.load %arg5[%c0_19, %c0_20] : memref<32x32xf32, #tpu.memory_space<vmem>>, vector<32x32xf32>
      tpu.vector_store %arg5[%c0_19, %c0_20], %18 {strides = array<i32>} : memref<32x32xf32, #tpu.memory_space<vmem>>, vector<32x32xf32>,
    } else {
    }
    %c0 = arith.constant 0 : index
    %c0_1 = arith.constant 0 : index
    %3 = vector.load %arg1[%c0, %c0_1] : memref<32x256xf32, #tpu.memory_space<vmem>>, vector<32x256xf32>
    %c0_2 = arith.constant 0 : index
    %c0_3 = arith.constant 0 : index
    %4 = vector.load %arg4[%c0_2, %c0_3] : memref<32x32xf32, #tpu.memory_space<vmem>>, vector<32x32xf32>
    %cst = arith.constant dense<0.000000e+00> : vector<32x32xf32>
    %5 = tpu.matmul %3, %3, %cst {dimension_numbers = #tpu.dot_dimension_numbers<[1], [1], [0], [0], [0, 0, 1, 0], [], []>} : vector<32x256xf32>, vector<32x256xf32>, vector<32x32xf32> -> vector<32x32xf32>
    %6 = arith.addf %4, %5 : vector<32x32xf32>
    %c0_4 = arith.constant 0 : index
    %c0_5 = arith.constant 0 : index
    %7 = vector.load %arg4[%c0_4, %c0_5] : memref<32x32xf32, #tpu.memory_space<vmem>>, vector<32x32xf32>
    tpu.vector_store %arg4[%c0_4, %c0_5], %6 {strides = array<i32>} : memref<32x32xf32, #tpu.memory_space<vmem>>, vector<32x32xf32>,
    %c0_6 = arith.constant 0 : index
    %c0_7 = arith.constant 0 : index
    %8 = vector.load %arg2[%c0_6, %c0_7] : memref<32x256xf32, #tpu.memory_space<vmem>>, vector<32x256xf32>
    %c0_8 = arith.constant 0 : index
    %c0_9 = arith.constant 0 : index
    %9 = vector.load %arg5[%c0_8, %c0_9] : memref<32x32xf32, #tpu.memory_space<vmem>>, vector<32x32xf32>
    %cst_10 = arith.constant dense<0.000000e+00> : vector<32x32xf32>
    %10 = tpu.matmul %8, %8, %cst_10 {dimension_numbers = #tpu.dot_dimension_numbers<[1], [1], [0], [0], [0, 0, 1, 0], [], []>} : vector<32x256xf32>, vector<32x256xf32>, vector<32x32xf32> -> vector<32x32xf32>
    %11 = arith.addf %9, %10 : vector<32x32xf32>
    %c0_11 = arith.constant 0 : index
    %c0_12 = arith.constant 0 : index
    %12 = vector.load %arg5[%c0_11, %c0_12] : memref<32x32xf32, #tpu.memory_space<vmem>>, vector<32x32xf32>
    tpu.vector_store %arg5[%c0_11, %c0_12], %11 {strides = array<i32>} : memref<32x32xf32, #tpu.memory_space<vmem>>, vector<32x32xf32>,
    %c0_i32_13 = arith.constant 0 : i32
    %13 = arith.cmpi eq, %arg0, %c0_i32_13 : i32
    %14 = arith.extui %13 : i1 to i32
    %c0_i32_14 = arith.constant 0 : i32
    %15 = arith.cmpi ne, %14, %c0_i32_14 : i32
    scf.if %15 {
      %c0_15 = arith.constant 0 : index
      %c0_16 = arith.constant 0 : index
      %16 = vector.load %arg4[%c0_15, %c0_16] : memref<32x32xf32, #tpu.memory_space<vmem>>, vector<32x32xf32>
      %c0_17 = arith.constant 0 : index
      %c0_18 = arith.constant 0 : index
      %17 = vector.load %arg5[%c0_17, %c0_18] : memref<32x32xf32, #tpu.memory_space<vmem>>, vector<32x32xf32>
      %18 = tpu.iota {dimensions = array<i32: 0>} : vector<32x32xi32>
      %19 = tpu.iota {dimensions = array<i32: 1>} : vector<32x32xi32>
      %20 = arith.cmpi eq, %18, %19 : vector<32x32xi32>
      %cst_19 = arith.constant 0.000000e+00 : f32
      %21 = vector.broadcast %cst_19 : f32 to vector<32x32xf32>
      %22 = arith.select %20, %16, %21 : vector<32x32xi1>, vector<32x32xf32>
      %cst_20 = arith.constant 0.000000e+00 : f32
      %23 = vector.broadcast %cst_20 : f32 to vector<32x32xf32>
      %24 = arith.select %20, %17, %23 : vector<32x32xi1>, vector<32x32xf32>
      %cst_21 = arith.constant dense<0.000000e+00> : vector<32xf32>
      %25 = vector.multi_reduction <add>, %22, %cst_21 [1] : vector<32x32xf32> to vector<32xf32>
      %26 = vector.shape_cast %25 : vector<32xf32> to vector<32x1xf32>
      %27 = math.sqrt %26 : vector<32x1xf32>
      %cst_22 = arith.constant 9.99999997E-7 : f32
      %28 = vector.broadcast %cst_22 : f32 to vector<32x1xf32>
      %29 = arith.addf %27, %28 : vector<32x1xf32>
      %cst_23 = arith.constant 1.000000e+00 : f32
      %30 = vector.broadcast %cst_23 : f32 to vector<32x1xf32>
      %31 = arith.divf %30, %29 : vector<32x1xf32>
      %cst_24 = arith.constant 1.000000e+00 : f32
      %32 = vector.broadcast %cst_24 : f32 to vector<32x1xf32>
      %33 = arith.mulf %31, %32 : vector<32x1xf32>
      %cst_25 = arith.constant dense<0.000000e+00> : vector<32xf32>
      %34 = vector.multi_reduction <add>, %24, %cst_25 [1] : vector<32x32xf32> to vector<32xf32>
      %35 = vector.shape_cast %34 : vector<32xf32> to vector<32x1xf32>
      %36 = math.sqrt %35 : vector<32x1xf32>
      %cst_26 = arith.constant 9.99999997E-7 : f32
      %37 = vector.broadcast %cst_26 : f32 to vector<32x1xf32>
      %38 = arith.addf %36, %37 : vector<32x1xf32>
      %39 = arith.divf %33, %38 : vector<32x1xf32>
      %cst_27 = arith.constant dense<0.000000e+00> : vector<32xf32>
      %40 = vector.multi_reduction <add>, %22, %cst_27 [0] : vector<32x32xf32> to vector<32xf32>
      %41 = vector.shape_cast %40 : vector<32xf32> to vector<1x32xf32>
      %42 = math.sqrt %41 : vector<1x32xf32>
      %cst_28 = arith.constant 9.99999997E-7 : f32
      %43 = vector.broadcast %cst_28 : f32 to vector<1x32xf32>
      %44 = arith.addf %42, %43 : vector<1x32xf32>
      %cst_29 = arith.constant 1.000000e+00 : f32
      %45 = vector.broadcast %cst_29 : f32 to vector<1x32xf32>
      %46 = arith.divf %45, %44 : vector<1x32xf32>
      %cst_30 = arith.constant 1.000000e+00 : f32
      %47 = vector.broadcast %cst_30 : f32 to vector<1x32xf32>
      %48 = arith.mulf %46, %47 : vector<1x32xf32>
      %cst_31 = arith.constant dense<0.000000e+00> : vector<32xf32>
      %49 = vector.multi_reduction <add>, %24, %cst_31 [0] : vector<32x32xf32> to vector<32xf32>
      %50 = vector.shape_cast %49 : vector<32xf32> to vector<1x32xf32>
      %51 = math.sqrt %50 : vector<1x32xf32>
      %cst_32 = arith.constant 9.99999997E-7 : f32
      %52 = vector.broadcast %cst_32 : f32 to vector<1x32xf32>
      %53 = arith.addf %51, %52 : vector<1x32xf32>
      %54 = arith.divf %48, %53 : vector<1x32xf32>
      %55 = arith.mulf %16, %17 : vector<32x32xf32>
      %56 = vector.broadcast %39 : vector<32x1xf32> to vector<32x32xf32>
      %57 = arith.mulf %55, %56 : vector<32x32xf32>
      %58 = vector.broadcast %54 : vector<1x32xf32> to vector<32x32xf32>
      %59 = arith.mulf %57, %58 : vector<32x32xf32>
      %60 = vector.shape_cast %59 : vector<32x32xf32> to vector<1x32x32xf32>
      %cst_33 = arith.constant dense<0.000000e+00> : vector<1xf32>
      %61 = vector.multi_reduction <add>, %60, %cst_33 [1, 2] : vector<1x32x32xf32> to vector<1xf32>
      %62 = vector.shape_cast %61 : vector<1xf32> to vector<1x1x1xf32>
      %63 = vector.extract %62[0, 0, 0] : f32 from vector<1x1x1xf32>
      %cst_34 = arith.constant 1.52587891E-5 : f32
      %64 = arith.mulf %63, %cst_34 : f32
      %65 = vector.broadcast %64 : f32 to vector<1x1xf32>
      %c0_35 = arith.constant 0 : index
      %c0_36 = arith.constant 0 : index
      %66 = vector.load %arg3[%c0_35, %c0_36] : memref<1x1xf32, #tpu.memory_space<vmem>>, vector<1x1xf32>
      tpu.vector_store %arg3[%c0_35, %c0_36], %65 {strides = array<i32>} : memref<1x1xf32, #tpu.memory_space<vmem>>, vector<1x1xf32>,
    } else {
    }
    return
  }
  func.func @transform_0(%arg0: i32) -> (i32, i32) {
    %c0_i32 = arith.constant 0 : i32
    %c0_i32_0 = arith.constant 0 : i32
    return %c0_i32, %arg0 : i32, i32
  }
  func.func @transform_1(%arg0: i32) -> (i32, i32) {
    %c0_i32 = arith.constant 0 : i32
    %c0_i32_0 = arith.constant 0 : i32
    return %c0_i32, %arg0 : i32, i32
  }
  func.func @transform_2(%arg0: i32) -> (i32, i32) {
    %c0_i32 = arith.constant 0 : i32
    %c0_i32_0 = arith.constant 0 : i32
    %c0_i32_1 = arith.constant 0 : i32
    return %c0_i32, %c0_i32_0 : i32, i32
  }
}

</mosaic_0001>

<bundles_post_ra>
// kernel: diff_loss.1
= control target key start
LH: loop header
LB: loop body
LE: loop exit
PB: predicated region body
PF: predicated region fallthrough
CT: control target
= control target key end

     0   :  { %vm16_vm0 = vcmask 261120   ;;  %v538_v7 = vmov 0.0   ;;  %s687_s0 = inlined_call_operand.vmem [shape: f32[32,256], index: 0, kind: input, shape index: {}]   ;;  %s688_s1 = inlined_call_operand.vmem [shape: f32[32,256], index: 1, kind: input, shape index: {}]   ;;  %s689_s2 = inlined_call_operand.hbm [shape: f32[1,1], index: 2, kind: output, shape index: {}]  }
   0x1   :  { %v26_v0 = vld [vmem:[%s687_s0 + $0x8] sm:$0xff]  ;;  %v28_v1 = vld [vmem:[%s687_s0 + $0x18] sm:$0xff]  ;;  %v25_v5 = vld [vmem:[%s687_s0] sm:$0xff]  ;;  %17 = vst.msk [vmem:[#allocation2] sm:$0xff] %vm16_vm0, %v538_v7 }
   0x2   :  { %v132_v2 = vld [vmem:[%s688_s1 + $0x8] sm:$0xff]  ;;  %v454_v3 = vpack.c.bf16 %v28_v1, %v26_v0  ;;  %v134_v4 = vld [vmem:[%s688_s1 + $0x18] sm:$0xff]  ;;  %v27_v6 = vld [vmem:[%s687_s0 + $0x10] sm:$0xff]  ;;  %101 = vmatprep.mubr.f32.mxu0 %v26_v0  ;;  %18 = vst.msk [vmem:[#allocation2 + $0x8] sm:$0xff] %vm16_vm0, %v538_v7 }
   0x3   :  { %207 = vmatprep.mubr.f32.mxu1 %v132_v2  ;;  %19 = vst.msk [vmem:[#allocation2 + $0x10] sm:$0xff] %vm16_vm0, %v538_v7  ;;  %20 = vst.msk [vmem:[#allocation2 + $0x18] sm:$0xff] %vm16_vm0, %v538_v7  ;;  %v462_v8 = vpack.c.bf16 %v134_v4, %v132_v2  ;;  %v456_v9 = vpack.c.bf16 %v27_v6, %v25_v5  ;;  %v131_v10 = vld [vmem:[%s688_s1] sm:$0xff]  ;;  %v133_v11 = vld [vmem:[%s688_s1 + $0x10] sm:$0xff] }
   0x4   :  { %21 = vst.msk [vmem:[#allocation3] sm:$0xff] %vm16_vm0, %v538_v7  ;;  %22 = vst.msk [vmem:[#allocation3 + $0x8] sm:$0xff] %vm16_vm0, %v538_v7  ;;  %v30_v12 = vld [vmem:[%s687_s0 + $0x28] sm:$0xff]  ;;  %455 = vmatprep.subr.bf16.mxu0 %v454_v3  ;;  %v464_v13 = vpack.c.bf16 %v133_v11, %v131_v10  ;;  %v32_v14 = vld [vmem:[%s687_s0 + $0x38] sm:$0xff] }
   0x5   :  { %23 = vst.msk [vmem:[#allocation3 + $0x10] sm:$0xff] %vm16_vm0, %v538_v7  ;;  %24 = vst.msk [vmem:[#allocation3 + $0x18] sm:$0xff] %vm16_vm0, %v538_v7  ;;  %v136_v15 = vld [vmem:[%s688_s1 + $0x28] sm:$0xff]  ;;  %v138_v16 = vld [vmem:[%s688_s1 + $0x38] sm:$0xff]  ;;  %463 = vmatprep.subr.bf16.mxu1 %v462_v8  ;;  %457 = vmatpush1.bf16.xpose.msra.mxu0 %v456_v9  ;;  %v458_v17 = vpack.c.bf16 %v32_v14, %v30_v12 }
   0x6   :  { %v466_v18 = vpack.c.bf16 %v138_v16, %v136_v15  ;;  %465 = vmatpush1.bf16.xpose.msra.mxu1 %v464_v13  ;;  %v29_v19 = vld [vmem:[%s687_s0 + $0x20] sm:$0xff]  ;;  %v31_v20 = vld [vmem:[%s687_s0 + $0x30] sm:$0xff] }
   0x7   :  { %7 = vsyncpa [#allocation5], 0  ;;  %459 = vmatprep.subr.bf16.mxu0 %v458_v17  ;;  %v135_v21 = vld [vmem:[%s688_s1 + $0x20] sm:$0xff]  ;;  %v137_v22 = vld [vmem:[%s688_s1 + $0x30] sm:$0xff]  ;;  %v460_v23 = vpack.c.bf16 %v31_v20, %v29_v19  ;;  %v247_v28 = vlaneseq  ;;  %s539_s0 = smov [#allocation4]  }
   0x8   :  { %467 = vmatprep.subr.bf16.mxu1 %v466_v18  ;;  %v468_v24 = vpack.c.bf16 %v137_v22, %v135_v21  ;;  %v33_v25 = vld [vmem:[#allocation2] sm:$0xff]  ;;  %s446_s1 = sshll.u32 %s539_s0, 4  ;;  %s447_s1 = int_to_ptr.vmem [resolvable:$true] %s446_s1 }
   0x9   :  { %v34_v34 = vld [vmem:[#allocation2 + $0x8] sm:$0xff]  ;;  %v248_v37 = vshrl.u32 %v247_v28, 7  ;;  %v613_v38 = vand.u32 127, %v247_v28  ;;  %s514_s15 = scalar_lea.vmem %s447_s1, 16  ;;  %s518_s16 = scalar_lea.vmem %s447_s1, 32 }
   0xa   :  { %v35_v44 = vld [vmem:[#allocation2 + $0x10] sm:$0xff]  ;;  %v36_v53 = vld [vmem:[#allocation2 + $0x18] sm:$0xff]  ;;  %p515_p0 = scmp.ne.s32.totalorder %s447_s1, %s514_s15  ;;  %p519_p1 = scmp.lt.s32.totalorder %s447_s1, %s447_s1 }
   0xb   :  { %v139_v26 = vld [vmem:[#allocation3] sm:$0xff]  ;;  %v140_v35 = vld [vmem:[#allocation3 + $0x8] sm:$0xff]  ;;  %vm254_vm1 = vcmp.eq.s32.totalorder %v248_v37, %v613_v38  ;;  %v249_v47 = vadd.s32 8, %v248_v37  ;;  %v250_v58 = vadd.s32 16, %v248_v37  ;;  %p520_p2 = scmp.lt.s32.totalorder %s518_s16, %s514_s15 }
   0xc   :  { %v141_v45 = vld [vmem:[#allocation3 + $0x10] sm:$0xff]  ;;  %v142_v55 = vld [vmem:[#allocation3 + $0x18] sm:$0xff] }
   0xd   :  { %461 = vmatpush1.bf16.xpose.msra.mxu0 %v460_v23  ;;  %vm255_vm2 = vcmp.eq.s32.totalorder %v249_v47, %v613_v38  ;;  %vm256_vm3 = vcmp.eq.s32.totalorder %v250_v58, %v613_v38  ;;  %p521_p3 = por %p520_p2, %p519_p1 }
   0xe   :  { %469 = vmatpush1.bf16.xpose.msra.mxu1 %v468_v24 }
   0xf   :  { %p522_p4 = pnand %p521_p3, %p515_p0 }
  0x14   :  { %102 = vmatmul.mubr.f32.vlgmr.msra.gmra.mrb[0].mxu0 %v25_v5 }
  0x15   :  { %208 = vmatmul.mubr.f32.vlgmr.msra.gmra.mrb[0].mxu1 %v131_v10  ;;  %106 = vmatprep.mubr.f32.mxu0 %v28_v1 }
  0x16   :  { %212 = vmatprep.mubr.f32.mxu1 %v134_v4 }
  0x18   :  { %107 = vmatmul.mubr.f32.gmra.mrb[2].mxu0 %v27_v6 }
  0x19   :  { %213 = vmatmul.mubr.f32.gmra.mrb[2].mxu1 %v133_v11  ;;  %111 = vmatprep.mubr.f32.mxu0 %v30_v12  ;;  %v251_v11 = vadd.s32 24, %v248_v37 }
  0x1a   :  { %217 = vmatprep.mubr.f32.mxu1 %v136_v15 }
  0x1b   :  { %vm257_vm4 = vcmp.eq.s32.totalorder %v251_v11, %v613_v38 }
  0x1c   :  { %112 = vmatmul.mubr.f32.gmra.mrb[4].mxu0 %v29_v19 }
  0x1d   :  { %218 = vmatmul.mubr.f32.gmra.mrb[4].mxu1 %v135_v21  ;;  %116 = vmatprep.mubr.f32.mxu0 %v32_v14 }
  0x1e   :  { %222 = vmatprep.mubr.f32.mxu1 %v138_v16 }
  0x20   :  { %117 = vmatmul.mubr.f32.gmra.mrb[6].mxu0 %v31_v20 }
  0x21   :  { %223 = vmatmul.mubr.f32.gmra.mrb[6].mxu1 %v137_v22 }
  0xe7   :  { %v103_v27 = vpop.f32.mrb[0].mxu0 }
  0xe8   :  { %v122_v29 = vadd.f32 %v103_v27, %v33_v25  ;;  %v209_v30 = vpop.f32.mrb[0].mxu1  ;;  %v105_v31 = vpop.f32.mrb[1].mxu0 }
  0xe9   :  { %v228_v32 = vadd.f32 %v209_v30, %v139_v26  ;;  %v211_v33 = vpop.f32.mrb[1].mxu1 }
  0xea   :  { %127 = vst.msk [vmem:[#allocation2] sm:$0xff] %vm16_vm0, %v122_v29 }
  0xeb   :  { %232 = vst.msk [vmem:[#allocation3] sm:$0xff] %vm16_vm0, %v228_v32  ;;  %v108_v36 = vpop.f32.mrb[2].mxu0 }
  0xec   :  { %v123_v39 = vadd.f32 %v108_v36, %v34_v34  ;;  %v214_v40 = vpop.f32.mrb[2].mxu1  ;;  %v110_v41 = vpop.f32.mrb[3].mxu0 }
  0xed   :  { %v229_v42 = vadd.f32 %v214_v40, %v140_v35  ;;  %v216_v43 = vpop.f32.mrb[3].mxu1 }
  0xee   :  { %128 = vst.msk [vmem:[#allocation2 + $0x8] sm:$0xff] %vm16_vm0, %v123_v39 }
  0xef   :  { %233 = vst.msk [vmem:[#allocation3 + $0x8] sm:$0xff] %vm16_vm0, %v229_v42  ;;  %v113_v46 = vpop.f32.mrb[4].mxu0 }
  0xf0   :  { %v124_v48 = vadd.f32 %v113_v46, %v35_v44  ;;  %v219_v49 = vpop.f32.mrb[4].mxu1  ;;  %v115_v50 = vpop.f32.mrb[5].mxu0 }
  0xf1   :  { %v230_v51 = vadd.f32 %v219_v49, %v141_v45  ;;  %v221_v52 = vpop.f32.mrb[5].mxu1  ;;  %v239_v54 = vld [vmem:[#allocation2] sm:$0xff] }
  0xf2   :  { %129 = vst.msk [vmem:[#allocation2 + $0x10] sm:$0xff] %vm16_vm0, %v124_v48  ;;  %v243_v56 = vld [vmem:[#allocation3] sm:$0xff]  ;;  %v258_v57 = vsel %vm254_vm1, %v239_v54, 0.0 }
  0xf3   :  { %234 = vst.msk [vmem:[#allocation3 + $0x10] sm:$0xff] %vm16_vm0, %v230_v51  ;;  %v118_v59 = vpop.f32.mrb[6].mxu0  ;;  %v262_v60 = vsel %vm254_vm1, %v243_v56, 0.0  ;;  %v266_v61 = vsel %vm16_vm0, %v258_v57, 0.0  ;;  %v625_v62 = vmul.f32 %v243_v56, %v239_v54 }
  0xf4   :  { %v125_v63 = vadd.f32 %v118_v59, %v36_v53  ;;  %v224_v0 = vpop.f32.mrb[6].mxu1  ;;  %v120_v1 = vpop.f32.mrb[7].mxu0  ;;  %v318_v2 = vsel %vm16_vm0, %v262_v60, 0.0  ;;  %267 = vadd.xlane.f32.xlu0 %v266_v61 }
  0xf5   :  { %v231_v3 = vadd.f32 %v224_v0, %v142_v55  ;;  %v226_v4 = vpop.f32.mrb[7].mxu1  ;;  %319 = vadd.xlane.f32.xlu1 %v318_v2  ;;  %v240_v5 = vld [vmem:[#allocation2 + $0x8] sm:$0xff] }
  0xf6   :  { %130 = vst.msk [vmem:[#allocation2 + $0x18] sm:$0xff] %vm16_vm0, %v125_v63  ;;  %v244_v6 = vld [vmem:[#allocation3 + $0x8] sm:$0xff]  ;;  %v259_v7 = vsel %vm255_vm2, %v240_v5, 0.0 }
  0xf7   :  { %235 = vst.msk [vmem:[#allocation3 + $0x18] sm:$0xff] %vm16_vm0, %v231_v3  ;;  %v263_v8 = vsel %vm255_vm2, %v244_v6, 0.0  ;;  %v269_v9 = vsel %vm16_vm0, %v259_v7, 0.0  ;;  %v633_v10 = vmul.f32 %v244_v6, %v240_v5 }
  0xf8   :  { %v321_v12 = vsel %vm16_vm0, %v263_v8, 0.0  ;;  %270 = vadd.xlane.f32.xlu0 %v269_v9  ;;  %v370_v13 = vadd.f32 %v269_v9, %v266_v61 }
  0xf9   :  { %322 = vadd.xlane.f32.xlu1 %v321_v12  ;;  %v389_v14 = vadd.f32 %v321_v12, %v318_v2  ;;  %v241_v15 = vld [vmem:[#allocation2 + $0x10] sm:$0xff] }
  0xfa   :  { %v245_v16 = vld [vmem:[#allocation3 + $0x10] sm:$0xff]  ;;  %v260_v17 = vsel %vm256_vm3, %v241_v15, 0.0 }
  0xfb   :  { %v264_v18 = vsel %vm256_vm3, %v245_v16, 0.0  ;;  %v272_v19 = vsel %vm16_vm0, %v260_v17, 0.0  ;;  %v637_v20 = vmul.f32 %v245_v16, %v241_v15 }
  0xfc   :  { %v324_v21 = vsel %vm16_vm0, %v264_v18, 0.0  ;;  %273 = vadd.xlane.f32.xlu0 %v272_v19  ;;  %v371_v22 = vadd.f32 %v370_v13, %v272_v19 }
  0xfd   :  { %325 = vadd.xlane.f32.xlu1 %v324_v21  ;;  %v390_v23 = vadd.f32 %v389_v14, %v324_v21  ;;  %v242_v24 = vld [vmem:[#allocation2 + $0x18] sm:$0xff] }
  0xfe   :  { %v246_v25 = vld [vmem:[#allocation3 + $0x18] sm:$0xff]  ;;  %v261_v26 = vsel %vm257_vm4, %v242_v24, 0.0 }
  0xff   :  { %v265_v27 = vsel %vm257_vm4, %v246_v25, 0.0  ;;  %v275_v28 = vsel %vm16_vm0, %v261_v26, 0.0  ;;  %v642_v29 = vmul.f32 %v246_v25, %v242_v24 }
 0x100   :  { %v327_v30 = vsel %vm16_vm0, %v265_v27, 0.0  ;;  %276 = vadd.xlane.f32.xlu0 %v275_v28  ;;  %v372_v31 = vadd.f32 %v371_v22, %v275_v28 }
 0x101   :  { %328 = vadd.xlane.f32.xlu1 %v327_v30  ;;  %v391_v32 = vadd.f32 %v390_v23, %v327_v30 }
 0x102   :  { %v373_v33 = vrot.slane %v372_v31, 4 }
 0x103   :  { %v392_v34 = vrot.slane %v391_v32, 4 }
 0x104   :  { %v374_v35 = vadd.f32 %v373_v33, %v372_v31 }
 0x105   :  { %v393_v36 = vadd.f32 %v392_v34, %v391_v32 }
 0x106   :  { %v375_v37 = vrot.slane %v374_v35, 2 }
 0x107   :  { %v394_v38 = vrot.slane %v393_v36, 2 }
 0x108   :  { %v376_v39 = vadd.f32 %v375_v37, %v374_v35 }
 0x109   :  { %v395_v40 = vadd.f32 %v394_v38, %v393_v36 }
 0x10a   :  { %v377_v41 = vrot.slane %v376_v39, 1 }
 0x10b   :  { %v396_v42 = vrot.slane %v395_v40, 1 }
 0x10c   :  { %v378_v43 = vadd.f32 %v377_v41, %v376_v39 }
 0x10d   :  { %v397_v44 = vadd.f32 %v396_v42, %v395_v40 }
 0x10e   :  { %474 = vrsqrt.f32 %v378_v43  ;;  %vm381_vm5 = vcmp.eq.f32.partialorder %v378_v43, inf  ;;  %v384_v49 = vand.u32 2147483648, %v378_v43  ;;  %vm383_vm7 = vcmp.eq.f32.partialorder %v378_v43, 0.0 }
 0x10f   :  { %476 = vrsqrt.f32 %v397_v44  ;;  %vm400_vm6 = vcmp.eq.f32.partialorder %v397_v44, inf  ;;  %v403_v50 = vand.u32 2147483648, %v397_v44  ;;  %vm402_vm8 = vcmp.eq.f32.partialorder %v397_v44, 0.0 }
 0x118   :  { %v475_v45 = vpop.eup %474 }
 0x119   :  { %v477_v46 = vpop.eup %476  ;;  %v380_v47 = vmul.f32 %v475_v45, %v378_v43 }
 0x11a   :  { %v399_v48 = vmul.f32 %v477_v46, %v397_v44 }
 0x11b   :  { %v382_v51 = vsel %vm381_vm5, %v378_v43, %v380_v47 }
 0x11c   :  { %v401_v52 = vsel %vm400_vm6, %v397_v44, %v399_v48  ;;  %v385_v53 = vsel %vm383_vm7, %v384_v49, %v382_v51 }
 0x11d   :  { %v386_v54 = vadd.f32 1e-06, %v385_v53  ;;  %v404_v55 = vsel %vm402_vm8, %v403_v50, %v401_v52 }
 0x11e   :  { %v405_v56 = vadd.f32 1e-06, %v404_v55 }
 0x11f   :  { %478 = vrcp.f32 %v386_v54 }
 0x120   :  { %480 = vrcp.f32 %v405_v56 }
 0x129   :  { %v479_v57 = vpop.eup %478 }
 0x12a   :  { %v481_v58 = vpop.eup %480 }
 0x12b   :  { %v645_v59 = vmul.f32 %v481_v58, %v479_v57 }
 0x181   :  { %v268_v60 = vpop.xlane.xlu0 %267 }
 0x182   :  { %v320_v61 = vpop.xlane.xlu1 %319  ;;  %482 = vrsqrt.f32 %v268_v60  ;;  %vm280_vm9 = vcmp.eq.f32.partialorder %v268_v60, inf  ;;  %vm282_vm10 = vcmp.eq.f32.partialorder %v268_v60, 0.0  ;;  %v283_v8 = vand.u32 2147483648, %v268_v60 }
 0x183   :  { %484 = vrsqrt.f32 %v320_v61  ;;  %vm332_vm11 = vcmp.eq.f32.partialorder %v320_v61, inf  ;;  %v335_v11 = vand.u32 2147483648, %v320_v61  ;;  %vm334_vm12 = vcmp.eq.f32.partialorder %v320_v61, 0.0 }
 0x185   :  { %v271_v63 = vpop.xlane.xlu0 %270 }
 0x186   :  { %v323_v0 = vpop.xlane.xlu1 %322  ;;  %486 = vrsqrt.f32 %v271_v63  ;;  %vm287_vm13 = vcmp.eq.f32.partialorder %v271_v63, inf  ;;  %vm289_vm14 = vcmp.eq.f32.partialorder %v271_v63, 0.0  ;;  %v290_v23 = vand.u32 2147483648, %v271_v63 }
 0x187   :  { %488 = vrsqrt.f32 %v323_v0  ;;  %vm339_vm15 = vcmp.eq.f32.partialorder %v323_v0, inf  ;;  %v342_v24 = vand.u32 2147483648, %v323_v0  ;;  %vm341_vm1 = vcmp.eq.f32.partialorder %v323_v0, 0.0 }
 0x189   :  { %v274_v1 = vpop.xlane.xlu0 %273 }
 0x18a   :  { %v326_v2 = vpop.xlane.xlu1 %325  ;;  %490 = vrsqrt.f32 %v274_v1  ;;  %vm294_vm2 = vcmp.eq.f32.partialorder %v274_v1, inf  ;;  %vm296_vm3 = vcmp.eq.f32.partialorder %v274_v1, 0.0  ;;  %v297_v36 = vand.u32 2147483648, %v274_v1 }
 0x18b   :  { %492 = vrsqrt.f32 %v326_v2  ;;  %vm346_vm4 = vcmp.eq.f32.partialorder %v326_v2, inf  ;;  %v349_v37 = vand.u32 2147483648, %v326_v2  ;;  %vm348_vm5 = vcmp.eq.f32.partialorder %v326_v2, 0.0 }
 0x18c   :  { %v483_v3 = vpop.eup %482 }
 0x18d   :  { %v485_v4 = vpop.eup %484  ;;  %v279_v5 = vmul.f32 %v483_v3, %v268_v60  ;;  %v647_v6 = vpop.xlane.xlu0 %276 }
 0x18e   :  { %v331_v7 = vmul.f32 %v485_v4, %v320_v61  ;;  %v649_v9 = vpop.xlane.xlu1 %328  ;;  %494 = vrsqrt.f32 %v647_v6  ;;  %vm301_vm6 = vcmp.eq.f32.partialorder %v647_v6, inf  ;;  %vm303_vm7 = vcmp.eq.f32.partialorder %v647_v6, 0.0 }
 0x18f   :  { %v281_v12 = vsel %vm280_vm9, %v268_v60, %v279_v5  ;;  %496 = vrsqrt.f32 %v649_v9  ;;  %v304_v48 = vand.u32 2147483648, %v647_v6  ;;  %vm353_vm8 = vcmp.eq.f32.partialorder %v649_v9, inf }
 0x190   :  { %v487_v13 = vpop.eup %486  ;;  %v333_v14 = vsel %vm332_vm11, %v320_v61, %v331_v7  ;;  %v284_v15 = vsel %vm282_vm10, %v283_v8, %v281_v12  ;;  %v356_v49 = vand.u32 2147483648, %v649_v9  ;;  %vm355_vm9 = vcmp.eq.f32.partialorder %v649_v9, 0.0 }
 0x191   :  { %v489_v16 = vpop.eup %488  ;;  %v336_v17 = vsel %vm334_vm12, %v335_v11, %v333_v14  ;;  %v306_v18 = vadd.f32 1e-06, %v284_v15  ;;  %v286_v19 = vmul.f32 %v487_v13, %v271_v63  ;;  %vm438_vm10 = vcmask 0  }
 0x192   :  { %v358_v21 = vadd.f32 1e-06, %v336_v17  ;;  %v338_v22 = vmul.f32 %v489_v16, %v323_v0 }
 0x193   :  { %498 = vrcp.f32 %v306_v18  ;;  %v288_v25 = vsel %vm287_vm13, %v271_v63, %v286_v19 }
 0x194   :  { %v491_v26 = vpop.eup %490  ;;  %500 = vrcp.f32 %v358_v21  ;;  %v340_v27 = vsel %vm339_vm15, %v323_v0, %v338_v22  ;;  %v291_v28 = vsel %vm289_vm14, %v290_v23, %v288_v25 }
 0x195   :  { %v493_v30 = vpop.eup %492  ;;  %v343_v31 = vsel %vm341_vm1, %v342_v24, %v340_v27  ;;  %v307_v32 = vadd.f32 1e-06, %v291_v28  ;;  %v293_v33 = vmul.f32 %v491_v26, %v274_v1 }
 0x196   :  { %v359_v34 = vadd.f32 1e-06, %v343_v31  ;;  %v345_v35 = vmul.f32 %v493_v30, %v326_v2 }
 0x197   :  { %502 = vrcp.f32 %v307_v32  ;;  %v295_v38 = vsel %vm294_vm2, %v274_v1, %v293_v33 }
 0x198   :  { %v495_v39 = vpop.eup %494  ;;  %504 = vrcp.f32 %v359_v34  ;;  %v347_v40 = vsel %vm346_vm4, %v326_v2, %v345_v35  ;;  %v298_v41 = vsel %vm296_vm3, %v297_v36, %v295_v38 }
 0x199   :  { %v497_v42 = vpop.eup %496  ;;  %v350_v43 = vsel %vm348_vm5, %v349_v37, %v347_v40  ;;  %v308_v44 = vadd.f32 1e-06, %v298_v41  ;;  %v300_v45 = vmul.f32 %v495_v39, %v647_v6 }
 0x19a   :  { %v360_v46 = vadd.f32 1e-06, %v350_v43  ;;  %v352_v47 = vmul.f32 %v497_v42, %v649_v9 }
 0x19b   :  { %506 = vrcp.f32 %v308_v44  ;;  %v302_v50 = vsel %vm301_vm6, %v647_v6, %v300_v45 }
 0x19c   :  { %508 = vrcp.f32 %v360_v46  ;;  %v354_v51 = vsel %vm353_vm8, %v649_v9, %v352_v47  ;;  %v305_v52 = vsel %vm303_vm7, %v304_v48, %v302_v50 }
 0x19d   :  { %v499_v53 = vpop.eup %498  ;;  %v357_v54 = vsel %vm355_vm9, %v356_v49, %v354_v51  ;;  %v309_v55 = vadd.f32 1e-06, %v305_v52 }
 0x19e   :  { %v501_v56 = vpop.eup %500  ;;  %v361_v57 = vadd.f32 1e-06, %v357_v54 }
 0x19f   :  { %510 = vrcp.f32 %v309_v55  ;;  %v363_v58 = vmul.f32 %v501_v56, %v499_v53 }
 0x1a0   :  { %512 = vrcp.f32 %v361_v57 }
 0x1a1   :  { %v503_v60 = vpop.eup %502  ;;  %v412_v61 = vmul.f32 %v625_v62, %v363_v58 }
 0x1a2   :  { %v505_v63 = vpop.eup %504 }
 0x1a3   :  { %v365_v0 = vmul.f32 %v505_v63, %v503_v60  ;;  %v416_v1 = vmul.f32 %v412_v61, %v645_v59 }
 0x1a5   :  { %v507_v2 = vpop.eup %506  ;;  %v413_v3 = vmul.f32 %v633_v10, %v365_v0  ;;  %v420_v9 = vsel %vm16_vm0, %v416_v1, 0.0 }
 0x1a6   :  { %v509_v4 = vpop.eup %508 }
 0x1a7   :  { %v367_v5 = vmul.f32 %v509_v4, %v507_v2  ;;  %v417_v6 = vmul.f32 %v413_v3, %v645_v59 }
 0x1a9   :  { %v511_v7 = vpop.eup %510  ;;  %v414_v8 = vmul.f32 %v637_v20, %v367_v5  ;;  %v421_v11 = vsel %vm16_vm0, %v417_v6, 0.0 }
 0x1aa   :  { %v513_v12 = vpop.eup %512  ;;  %v422_v62 = vadd.f32 %v421_v11, %v420_v9 }
 0x1ab   :  { %v369_v13 = vmul.f32 %v513_v12, %v511_v7  ;;  %v418_v14 = vmul.f32 %v414_v8, %v645_v59 }
 0x1ad   :  { %v415_v15 = vmul.f32 %v642_v29, %v369_v13  ;;  %v423_v10 = vsel %vm16_vm0, %v418_v14, 0.0 }
 0x1ae   :  { %v424_v16 = vadd.f32 %v423_v10, %v422_v62 }
 0x1af   :  { %v419_v17 = vmul.f32 %v415_v15, %v645_v59 }
 0x1b1   :  { %v425_v18 = vsel %vm16_vm0, %v419_v17, 0.0 }
 0x1b2   :  { %v426_v19 = vadd.f32 %v425_v18, %v424_v16 }
 0x1b4   :  { %427 = vadd.xlane.f32.xlu0 %v426_v19 }
 0x241   :  { %v428_v20 = vpop.xlane.xlu0 %427 }
 0x242   :  { %v429_v21 = vrot.slane %v428_v20, 4 }
 0x244   :  { %v430_v22 = vadd.f32 %v429_v21, %v428_v20 }
 0x246   :  { %v431_v23 = vrot.slane %v430_v22, 2 }
 0x248   :  { %v432_v24 = vadd.f32 %v431_v23, %v430_v22 }
 0x24a   :  { %v433_v25 = vrot.slane %v432_v24, 1 }
 0x24c   :  { %v434_v26 = vadd.f32 %v433_v25, %v432_v24 }
 0x24e   :  { %470 = vpush %v434_v26 }
 0x27f   :  { %s471_s13 = spop %470 }
 0x280   :  { %s436_s14 = smul.f32 1.5258789e-05, %s471_s13 }
 0x282   :  { %v437_v29 = vstv %s436_s14 }
 0x283   :  { %439 = vst.msk [vmem:[#allocation4] sm:$0x1] %vm438_vm10, %v437_v29 }
 0x284   :  { %525 = shalt.err (!%p522_p4)
}
 0x285   :  { %s526_s19 = scalar_lea.hbm %s689_s2, 16 }
 0x286   :  { %p527_p5 = scmp.ne.s32.totalorder %s689_s2, %s526_s19  ;;  %p530_p6 = scmp.lt.u32.totalorder %s526_s19, %s689_s2 }
 0x288   :  { %p532_p7 = pnand %p530_p6, %p527_p5 }
 0x28a   :  { %535 = shalt.err (!%p532_p7)
}
 0x28b   :  { %449 = dma.vmem_to_hbm [thread:$0]  %s447_s1, 16, %s689_s2, [#allocation5]  }
 0x28c   :  { %536 = dma.done.wait [#allocation5], 16  }
 0x28d   :  { %537 = vsyncadd [#allocation5], 4294967280 }
 0x28e   :  { %453 = vsyncpa [#allocation5], 1 }

</bundles_post_ra>
